<compile_context>
chip_gen: v6e
topology: v6e:2x2x1
jax: 0.10.0
libtpu: 0.0.40
codegen_flags: <defaults>
</compile_context>

<pallas_src>
import functools

import jax
import jax.numpy as jnp
from jax import lax
from jax.experimental import pallas as pl
from jax.experimental.pallas import tpu as pltpu


def _smooth_ap_kernel(preds_ref, out_ref, *, anneal, batch_size, num_id,
                      row_tile, compute_dtype):
    B = batch_size
    g = B // num_id
    tb = row_tile
    # sigmoid(x / temp) == 0.5 * tanh(x * 0.5 / temp) + 0.5
    scale = 0.5 / float(anneal)

    c = pl.program_id(0)                                   # class index
    r = pl.program_id(1)                                   # row tile in class
    cls_start = pl.multiple_of(c * g, g)
    row_start = pl.multiple_of(cls_start + r * tb, tb)

    preds = preds_ref[...]                                 # (B, D) native dtype
    rows = preds_ref[pl.ds(row_start, tb), :]              # (tb, D) query rows
    cls_rows = preds_ref[pl.ds(cls_start, g), :]           # (g, D) positive set

    # Affinities. Scale is folded into the *small* results (not the slab) and
    # they are cast to compute_dtype here, so the big (tb, g, B) slab below is
    # formed directly in compute_dtype.
    sim_all = lax.dot_general(rows, preds, (((1,), (1,)), ((), ())),
                              preferred_element_type=jnp.float32)      # (tb, B)
    sim_cls = lax.dot_general(rows, cls_rows, (((1,), (1,)), ((), ())),
                              preferred_element_type=jnp.float32)      # (tb, g)
    sim_all = (sim_all * scale).astype(compute_dtype)
    sim_cls = (sim_cls * scale).astype(compute_dtype)

    # diff[i, j, k] = scale * (sim[i, k] - sim[i, j]); j runs over the class
    # block only (the loss only ever uses the diagonal class blocks of
    # sim_all_rk), k over the full batch.
    diff = sim_all[:, None, :] - sim_cls[:, :, None]       # (tb, g, B)
    t = jnp.tanh(diff)                                     # EUP; only slab op

    # Both k-reductions in one idle-MXU matmul: column 0 of `red` is all-ones
    # (full-batch rank), column 1 is the class-block indicator (positive rank).
    k_idx = lax.broadcasted_iota(jnp.int32, (B, 2), 0)
    col_idx = lax.broadcasted_iota(jnp.int32, (B, 2), 1)
    in_blk = (k_idx >= cls_start) & (k_idx < cls_start + g)
    red = jnp.where((col_idx == 0) | in_blk, 1.0, 0.0).astype(compute_dtype)

    # NOTE: reshape is layout-preserving when g % 8 == 0 (otherwise a copy).
    sums = lax.dot_general(t.reshape(tb * g, B), red,
                           (((1,), (0,)), ((), ())),
                           preferred_element_type=jnp.float32)         # (tb*g, 2)

    # sigmoid = 0.5*tanh + 0.5 and the masked k == j term is exactly 0.5, so
    #   all_rk = 0.5*(sum_all + B + 1),   pos_rk = 0.5*(sum_blk + g + 1),
    # and the 0.5 factors cancel in the ratio.
    ratio = (sums[:, 1:2] + (g + 1.0)) / (sums[:, 0:1] + (B + 1.0))    # (tb*g, 1)

    part = jnp.sum(ratio, axis=0, keepdims=True) * (1.0 / (g * B))     # (1, 1)
    # Lane-dense writeback; wrapper reads [c, r, 0, 0].
    out_ref[...] = jnp.broadcast_to(part.reshape(1, 1, 1, 1), out_ref.shape)


def _default_budgets():
    """(slab_budget_bytes, vmem_limit_bytes) keyed off the TPU generation."""
    try:
        kind = jax.devices()[0].device_kind.lower()
    except Exception:  # unknown backend -> conservative
        kind = ""
    if "v5" in kind or "v6" in kind:
        # 128 MiB physical VMEM: bigger tiles amortize per-step overhead.
        return 8 * 1024 * 1024, 96 * 1024 * 1024
    # v7x (64 MiB VMEM) or unknown: stay conservative.
    return 4 * 1024 * 1024, 48 * 1024 * 1024


def smooth_ap_loss(preds, *, anneal, batch_size, num_id, feat_dims,
                   compute_dtype=jnp.float32,
                   slab_budget_bytes=None,
                   vmem_limit_bytes=None,
                   single_buffer_input=False):
    """Smooth-AP loss. Returns shape (1,), matching the PyTorch module."""
    assert preds.shape == (batch_size, feat_dims)
    assert batch_size % num_id == 0
    g = batch_size // num_id

    default_slab, default_vmem = _default_budgets()
    if slab_budget_bytes is None:
        slab_budget_bytes = default_slab
    if vmem_limit_bytes is None:
        vmem_limit_bytes = default_vmem

    # Honest per-tile accounting: ~3 live (tb, g, B) compute_dtype slabs
    # (diff, tanh, possible reshape copy) plus the small sims / sums.
    itemsize = jnp.dtype(compute_dtype).itemsize
    bytes_per_row = 3 * g * batch_size * itemsize + 8 * g + 4 * (batch_size + g)
    max_tb = max(1, slab_budget_bytes // bytes_per_row)
    tb = 1
    for d in range(1, g + 1):
        if g % d == 0 and d <= max_tb:
            tb = d
    n_r = g // tb

    kernel = functools.partial(
        _smooth_ap_kernel, anneal=anneal, batch_size=batch_size,
        num_id=num_id, row_tile=tb, compute_dtype=compute_dtype)

    in_spec_kwargs = {}
    if single_buffer_input:
        # preds never changes across grid steps; on v7x (64 MiB VMEM) drop the
        # double buffer for it.
        in_spec_kwargs["pipeline_mode"] = pl.Buffered(1)
    in_spec = pl.BlockSpec((batch_size, feat_dims), lambda cc, rr: (0, 0),
                           **in_spec_kwargs)

    B = batch_size
    cost = pl.CostEstimate(
        flops=int(2 * B * feat_dims * (B + g) + 5 * g * B * B),
        transcendentals=int(g * B * B),
        bytes_accessed=int(B * feat_dims * jnp.dtype(preds.dtype).itemsize
                           + num_id * n_r * 8 * 128 * 4),
    )

    out = pl.pallas_call(
        kernel,
        out_shape=jax.ShapeDtypeStruct((num_id, n_r, 8, 128), jnp.float32),
        grid=(num_id, n_r),
        in_specs=[in_spec],
        out_specs=pl.BlockSpec((1, 1, 8, 128), lambda cc, rr: (cc, rr, 0, 0)),
        compiler_params=pltpu.CompilerParams(
            dimension_semantics=("parallel", "parallel"),
            vmem_limit_bytes=vmem_limit_bytes),
        cost_estimate=cost,
    )(preds)

    ap = jnp.sum(out[:, :, 0, 0])
    return (1.0 - ap).reshape(1)


# ---- pure-JAX reference (mirrors the PyTorch module 1:1) --------------------
def _temp_sigmoid(t, temp):
    exponent = jnp.clip(-t / temp, -50.0, 50.0)
    return 1.0 / (1.0 + jnp.exp(exponent))


def smooth_ap_ref(preds, anneal, batch_size, num_id, feat_dims):
    group = batch_size // num_id
    mask = 1.0 - jnp.eye(batch_size, dtype=jnp.float32)
    sim_all = preds @ preds.T
    sim_diff = sim_all[:, None, :] - sim_all[:, :, None]
    sim_sg = _temp_sigmoid(sim_diff, anneal) * mask
    sim_all_rk = jnp.sum(sim_sg, axis=-1) + 1.0
    xs = preds.reshape(num_id, group, feat_dims)
    pos_mask = 1.0 - jnp.eye(group, dtype=jnp.float32)
    sim_pos = jnp.einsum("cid,cjd->cij", xs, xs)
    sim_pos_diff = sim_pos[:, :, None, :] - sim_pos[:, :, :, None]
    sim_pos_sg = _temp_sigmoid(sim_pos_diff, anneal) * pos_mask
    sim_pos_rk = jnp.sum(sim_pos_sg, axis=-1) + 1.0
    ap = jnp.zeros((1,), jnp.float32)
    for ind in range(num_id):
        s = ind * group
        sl = sim_all_rk[s:s + group, s:s + group]
        pos_divide = jnp.sum(sim_pos_rk[ind] / sl)
        ap = ap + pos_divide / group / batch_size
    return 1.0 - ap


if __name__ == "__main__":
    anneal = 0.01
    key = jax.random.PRNGKey(0)

    # Config 1: single row tile per class.
    batch_size, num_id, feat_dims = 16, 2, 32
    preds = jax.random.normal(key, (batch_size, feat_dims), dtype=jnp.float32)
    loss = smooth_ap_loss(preds, anneal=anneal, batch_size=batch_size,
                          num_id=num_id, feat_dims=feat_dims)
    loss = jax.block_until_ready(loss)
    ref = smooth_ap_ref(preds, anneal, batch_size, num_id, feat_dims)
    assert loss.shape == (1,)
    assert jnp.allclose(loss, ref, rtol=1e-4, atol=1e-4), (loss, ref)

    # Config 2: tiny slab budget to force multiple row tiles per class
    # (exercises the 2-D grid / partial-sum path).
    batch_size2, num_id2, feat_dims2 = 24, 3, 16
    key2 = jax.random.PRNGKey(0)
    preds2 = jax.random.normal(key2, (batch_size2, feat_dims2), dtype=jnp.float32)
    loss2 = smooth_ap_loss(preds2, anneal=anneal, batch_size=batch_size2,
                           num_id=num_id2, feat_dims=feat_dims2,
                           slab_budget_bytes=1024)
    loss2 = jax.block_until_ready(loss2)
    ref2 = smooth_ap_ref(preds2, anneal, batch_size2, num_id2, feat_dims2)
    assert loss2.shape == (1,)
    assert jnp.allclose(loss2, ref2, rtol=1e-4, atol=1e-4), (loss2, ref2)

    print("KERNEL_OK")
</pallas_src>

<mosaic_0001>
module attributes {stable_mosaic.version = 11 : i64} {
  func.func @_smooth_ap_kernel(%arg0: i32, %arg1: i32, %arg2: memref<16x32xf32, #tpu.memory_space<vmem>>, %arg3: memref<1x1x8x128xf32, #tpu.memory_space<vmem>>) attributes {dimension_semantics = [#tpu.dimension_semantics<parallel>, #tpu.dimension_semantics<parallel>], iteration_bounds = array<i64: 2, 1>, scalar_prefetch = 0 : i64, scratch_operands = 0 : i64, tpu.core_type = #tpu.core_type<tc>, window_params = [{pipeline_mode = #tpu.pipeline_mode<synchronous>, transform_indices = @transform_0, window_bounds = array<i64: 16, 32>}, {transform_indices = @transform_1, window_bounds = array<i64: 1, 1, 8, 128>}]} {
    %c8_i32 = arith.constant 8 : i32
    %0 = arith.muli %arg0, %c8_i32 : i32
    %1 = tpu.assume_multiple %0, 8 : i32
    %c8_i32_0 = arith.constant 8 : i32
    %2 = arith.muli %arg1, %c8_i32_0 : i32
    %3 = arith.addi %1, %2 : i32
    %4 = tpu.assume_multiple %3, 8 : i32
    %c0 = arith.constant 0 : index
    %c0_1 = arith.constant 0 : index
    %5 = vector.load %arg2[%c0, %c0_1] : memref<16x32xf32, #tpu.memory_space<vmem>>, vector<16x32xf32>
    %6 = arith.index_cast %4 : i32 to index
    %c0_2 = arith.constant 0 : index
    %7 = vector.load %arg2[%6, %c0_2] : memref<16x32xf32, #tpu.memory_space<vmem>>, vector<8x32xf32>
    %8 = arith.index_cast %1 : i32 to index
    %c0_3 = arith.constant 0 : index
    %9 = vector.load %arg2[%8, %c0_3] : memref<16x32xf32, #tpu.memory_space<vmem>>, vector<8x32xf32>
    %cst = arith.constant dense<0.000000e+00> : vector<8x16xf32>
    %10 = tpu.matmul %7, %5, %cst {dimension_numbers = #tpu.dot_dimension_numbers<[1], [1], [0], [0], [0, 0, 1, 0], [], []>} : vector<8x32xf32>, vector<16x32xf32>, vector<8x16xf32> -> vector<8x16xf32>
    %cst_4 = arith.constant dense<0.000000e+00> : vector<8x8xf32>
    %11 = tpu.matmul %7, %9, %cst_4 {dimension_numbers = #tpu.dot_dimension_numbers<[1], [1], [0], [0], [0, 0, 1, 0], [], []>} : vector<8x32xf32>, vector<8x32xf32>, vector<8x8xf32> -> vector<8x8xf32>
    %cst_5 = arith.constant 5.000000e+01 : f32
    %12 = vector.broadcast %cst_5 : f32 to vector<8x16xf32>
    %13 = arith.mulf %10, %12 : vector<8x16xf32>
    %cst_6 = arith.constant 5.000000e+01 : f32
    %14 = vector.broadcast %cst_6 : f32 to vector<8x8xf32>
    %15 = arith.mulf %11, %14 : vector<8x8xf32>
    %16 = vector.shape_cast %13 : vector<8x16xf32> to vector<8x1x16xf32>
    %17 = vector.shape_cast %15 : vector<8x8xf32> to vector<8x8x1xf32>
    %18 = vector.broadcast %16 : vector<8x1x16xf32> to vector<8x8x16xf32>
    %19 = vector.broadcast %17 : vector<8x8x1xf32> to vector<8x8x16xf32>
    %20 = arith.subf %18, %19 : vector<8x8x16xf32>
    %21 = math.tanh %20 : vector<8x8x16xf32>
    %22 = tpu.iota {dimensions = array<i32: 0>} : vector<16x2xi32>
    %23 = tpu.iota {dimensions = array<i32: 1>} : vector<16x2xi32>
    %24 = vector.broadcast %1 : i32 to vector<16x2xi32>
    %25 = arith.cmpi sge, %22, %24 : vector<16x2xi32>
    %c8_i32_7 = arith.constant 8 : i32
    %26 = arith.addi %1, %c8_i32_7 : i32
    %27 = vector.broadcast %26 : i32 to vector<16x2xi32>
    %28 = arith.cmpi slt, %22, %27 : vector<16x2xi32>
    %29 = arith.andi %25, %28 : vector<16x2xi1>
    %c0_i32 = arith.constant 0 : i32
    %30 = vector.broadcast %c0_i32 : i32 to vector<16x2xi32>
    %31 = arith.cmpi eq, %23, %30 : vector<16x2xi32>
    %32 = arith.ori %31, %29 : vector<16x2xi1>
    %cst_8 = arith.constant 1.000000e+00 : f32
    %cst_9 = arith.constant 0.000000e+00 : f32
    %33 = vector.broadcast %cst_8 : f32 to vector<16x2xf32>
    %34 = vector.broadcast %cst_9 : f32 to vector<16x2xf32>
    %35 = arith.select %32, %33, %34 : vector<16x2xi1>, vector<16x2xf32>
    %36 = vector.shape_cast %21 : vector<8x8x16xf32> to vector<64x16xf32>
    %cst_10 = arith.constant dense<0.000000e+00> : vector<64x2xf32>
    %37 = tpu.matmul %36, %35, %cst_10 {dimension_numbers = #tpu.dot_dimension_numbers<[1], [0], [0], [1], [0, 0, 1, 1], [], []>} : vector<64x16xf32>, vector<16x2xf32>, vector<64x2xf32> -> vector<64x2xf32>
    %38 = vector.extract_strided_slice %37 {offsets = [0, 1], sizes = [64, 1], strides = [1, 1]} : vector<64x2xf32> to vector<64x1xf32>
    %cst_11 = arith.constant 9.000000e+00 : f32
    %39 = vector.broadcast %cst_11 : f32 to vector<64x1xf32>
    %40 = arith.addf %38, %39 : vector<64x1xf32>
    %41 = vector.extract_strided_slice %37 {offsets = [0, 0], sizes = [64, 1], strides = [1, 1]} : vector<64x2xf32> to vector<64x1xf32>
    %cst_12 = arith.constant 1.700000e+01 : f32
    %42 = vector.broadcast %cst_12 : f32 to vector<64x1xf32>
    %43 = arith.addf %41, %42 : vector<64x1xf32>
    %44 = arith.divf %40, %43 : vector<64x1xf32>
    %cst_13 = arith.constant dense<0.000000e+00> : vector<1xf32>
    %45 = vector.multi_reduction <add>, %44, %cst_13 [0] : vector<64x1xf32> to vector<1xf32>
    %46 = vector.shape_cast %45 : vector<1xf32> to vector<1x1xf32>
    %cst_14 = arith.constant 7.812500e-03 : f32
    %47 = vector.broadcast %cst_14 : f32 to vector<1x1xf32>
    %48 = arith.mulf %46, %47 : vector<1x1xf32>
    %49 = vector.shape_cast %48 : vector<1x1xf32> to vector<1x1x1x1xf32>
    %50 = vector.shape_cast %49 : vector<1x1x1x1xf32> to vector<1x1x1x1xf32>
    %51 = vector.broadcast %50 : vector<1x1x1x1xf32> to vector<1x1x8x128xf32>
    %c0_15 = arith.constant 0 : index
    %c0_16 = arith.constant 0 : index
    %c0_17 = arith.constant 0 : index
    %c0_18 = arith.constant 0 : index
    %52 = vector.load %arg3[%c0_15, %c0_16, %c0_17, %c0_18] : memref<1x1x8x128xf32, #tpu.memory_space<vmem>>, vector<1x1x8x128xf32>
    tpu.vector_store %arg3[%c0_15, %c0_16, %c0_17, %c0_18], %51 {strides = array<i32>} : memref<1x1x8x128xf32, #tpu.memory_space<vmem>>, vector<1x1x8x128xf32>,
    return
  }
  func.func @transform_0(%arg0: i32, %arg1: i32) -> (i32, i32) {
    %c0_i32 = arith.constant 0 : i32
    %c0_i32_0 = arith.constant 0 : i32
    %c0_i32_1 = arith.constant 0 : i32
    return %c0_i32, %c0_i32_0 : i32, i32
  }
  func.func @transform_1(%arg0: i32, %arg1: i32) -> (i32, i32, i32, i32) {
    %c0_i32 = arith.constant 0 : i32
    %c0_i32_0 = arith.constant 0 : i32
    %c0_i32_1 = arith.constant 0 : i32
    return %arg0, %arg1, %c0_i32, %c0_i32_0 : i32, i32, i32, i32
  }
}

</mosaic_0001>

<bundles_post_ra>
// kernel: tpu_custom_call.1
= control target key start
LH: loop header
LB: loop body
LE: loop exit
PB: predicated region body
PF: predicated region fallthrough
CT: control target
= control target key end

     0   :  { %6 = vsyncpa [#allocation3], 0  ;;  %s1259_s0 = inlined_call_operand.hbm [shape: f32[16,32], index: 0, kind: input, shape index: {}]   ;;  %s1260_s1 = inlined_call_operand.hbm [shape: f32[2,1,8,128], index: 1, kind: output, shape index: {}]  }
   0x1   :  { %7 = vsyncpa [#allocation4], 0 }
   0x2   :  { %9 = vsyncpa [#allocation4 + $0x1], 0  ;;  %s1086_s6 = smov 0   ;;  %s1088_s7 = smov 0  }
   0x3   :  { %s1090_s8 = smov 0   ;;  %s1092_s9 = smov 0  }
   0x4   :  { %s1094_s10 = smov 0   ;;  %s1096_s11 = smov 0  }
   0x5 LB: > { %s781_s12 = sadd.s32 4294967295, %s1064_s11   ;;  %s782_s13 = sadd.s32 4294967294, %s1064_s11   ;;  %s1064_s11 = sphi %s1096_s11, %s15_s11   ;;  %s1060_s10 = sphi %s1094_s10, %s1269_s10   ;;  %s1056_s9 = sphi %s1092_s9, %s1268_s9   ;;  %s1052_s8 = sphi %s1090_s8, %s1267_s8   ;;  %s1048_s7 = sphi %s1088_s7, %s1266_s7   ;;  %s1044_s6 = sphi %s1086_s6, %s1265_s6  }
   0x6   : > { %s27_s14 = sadd.s32 1, %s1060_s10  ;;  %s57_s15 = sadd.s32 1, %s1052_s8 }
   0x7   : > { %p29_p0 = scmp.ge.s32.totalorder %s27_s14, 2  ;;  %p67_p1 = scmp.ne.s32.totalorder %s1052_s8, %s1048_s7 }
   0x8   : > { %p68_p2 = scmp.eq.s32.totalorder %s781_s12, 1  ;;  %p73_p3 = scmp.ne.s32.totalorder %s1048_s7, %s1044_s6 }
   0x9   : > { %s1271_s14 = smov (%p29_p0, %s27_s14), 0  ;;  %p74_p5 = scmp.eq.s32.totalorder %s782_s13, 1 }
   0xa   : > { %p1126_p4 = por %p68_p2, %p67_p1  ;;  %s52_s17 = ssub.s32 %s1060_s10, %s1271_s14 }
   0xb   : > { %p783_p6 = scmp.ge.s32.totalorder %s1064_s11, 1  ;;  %p55_p7 = scmp.eq.s32.totalorder %s52_s17, 0 }
   0xc   : > { %p1133_p8 = por %p74_p5, %p73_p3  ;;  %p81_p9 = scmp.lt.s32.totalorder %s1064_s11, 3 }
   0xd   : > { %s1139_s19 = scalar_select %p55_p7, %s1052_s8, %s57_s15  }
   0xe   : > { %p1141_p10 = pnand %p783_p6, %p81_p9  ;;  %p1145_p11 = scmp.eq.s32.totalorder %s781_s12, 0 }
   0xf   : > { %s1066_s22 = smov [#allocation2]  }
  0x10   : > { %p857_p12 = pneg %p1141_p10  ;;  %s93_s23 = sshll.u32 %s1066_s22, 4  ;;  %s94_s23 = int_to_ptr.vmem [resolvable:$true] %s93_s23 }
  0x11   : > { %s969_s24 = scalar_lea.vmem %s94_s23, 256  ;;  %p977_p5 = scmp.lt.s32.totalorder %s94_s23, %s94_s23 }
  0x12   : > { %p858_p13 = pnand %p1145_p11, %p857_p12  ;;  %p970_p1 = scmp.ne.s32.totalorder %s94_s23, %s969_s24 }
  0x13   : > { %p978_p6 = scmp.lt.s32.totalorder %s969_s24, %s969_s24 }
  0x14   : > { %p960_p0 = pneg %p858_p13 }
  0x15   : > { %p979_p7 = por %p978_p6, %p977_p5 }
  0x16   : > { %p972_p2 = pnand %p970_p1, %p960_p0 }
  0x18   : > { %p973_p3 = pneg %p972_p2 }
  0x1a   : > { %p980_p9 = pnand %p979_p7, %p973_p3 }
  0x1c   : > { %983 = shalt.err (!%p980_p9)
}
  0x1d   : > { %s1067_s25 = smov 128   ;;  %s1068_s26 = smov 8  }
  0x1e   : > { %860 = dma.hbm_to_vmem [thread:$0]  (!%p858_p13), %s1259_s0, 256, %s94_s23, [#allocation3], %s1067_s25, %s1067_s25, %s1068_s26  }
  0x1f   : > { %109 = sbr.rel (%p1141_p10) target bundleno = 878 (0x36e), region = 24 }
  0x24   : > { %1035 = dma.done.wait (%p1145_p11), [#allocation3], 256  }
  0x25   : > { %1037 = vsyncadd (%p1145_p11), [#allocation3], 4294967040  ;;  %v1069_v0 = vmov 0.0   ;;  %vm1070_vm0 = vmmov 0   ;;  %vm133_vm1 = vcmask 261120   ;;  %s1163_s29 = sshll.u32 %s1056_s9, 3  ;;  %v293_v6 = vlaneseq }
  0x26   : > { %823 = vmatprep.subr.mxu0 %v1069_v0  ;;  %827 = vmatprep.mubr.msk.f32.mxu0 %vm1070_vm0, %v1069_v0  ;;  %v128_v1 = vld [vmem:[#allocation2 + $0x8] sm:$0xff]  ;;  %v127_v2 = vld [vmem:[#allocation2] sm:$0xff]  ;;  %s129_s30 = scalar_lea.vmem [#allocation2], %s1163_s29  ;;  %v1071_v4 = vmov 1966171168   ;;  %s458_s2 = sadd.s32 8, %s1163_s29  ;;  %v455_v46 = vstv %s1163_s29 }
  0x27   : > { %824 = vmatpush3.xpose.msk.msra.mxu0 %vm133_vm1, %v128_v1  ;;  %v130_v3 = vld [vmem:[%s129_s30] sm:$0xff]  ;;  %v291_v5 = vunpack.c.l.s4 %v1071_v4  ;;  %v1166_v8 = vshrl.u32 %v293_v6, 7  ;;  %v454_v42 = vand.u32 127, %v293_v6  ;;  %v459_v48 = vstv %s458_s2  ;;  %s1073_s3 = smov 1   ;;  %s121_s4 = sand.u32 1, %s1048_s7  }
  0x28   : > { %825 = vmatprep.subr.mxu0 %v1069_v0  ;;  %v1072_v57 = vmov 1.0   ;;  %vm469_vm11 = vcmask 130048   ;;  %vm663_vm12 = vcmask 15368   ;;  %s787_s5 = sshll.u32 %s121_s4, 3  ;;  %s805_s15 = sshll.u32 %s1056_s9, 7 }
  0x29   : > { %v292_v7 = vunpack.c.0.s8 %v291_v5  ;;  %v354_v15 = vsub.s32 2, %v1166_v8  ;;  %v1171_v16 = vsub.s32 0, %v1166_v8  ;;  %v361_v18 = vsub.s32 3, %v1166_v8  ;;  %s123_s12 = scalar_lea.vmem [#allocation5], %s787_s5  ;;  %s705_s21 = scalar_lea.hbm %s1260_s1, %s805_s15 }
  0x2a   : > { %v347_v24 = vsub.s32 1, %v1166_v8  ;;  %v375_v28 = vsub.s32 5, %v1166_v8  ;;  %v368_v29 = vsub.s32 4, %v1166_v8  ;;  %v389_v30 = vsub.s32 7, %v1166_v8  ;;  %s707_s13 = sshll.u32 %s123_s12, 4  ;;  %s693_s22 = scalar_lea.sflag [#allocation4], %s121_s4  ;;  %s1216_s13 = int_to_ptr.vmem [resolvable:$true] %s707_s13 }
  0x2b   : > { %826 = vmatpush3.xpose.msk.msra.mxu0 %vm133_vm1, %v127_v2  ;;  %v295_v9 = vsub.s32 %v292_v7, %v1166_v8  ;;  %v382_v31 = vsub.s32 6, %v1166_v8  ;;  %v452_v38 = vadd.s32 8, %v1166_v8  ;;  %vm456_vm2 = vcmp.ge.s32.totalorder %v1166_v8, %v455_v46  ;;  %s984_s23 = scalar_lea.vmem %s1216_s13, 128  ;;  %s1075_s24 = smov [#allocation5]  }
  0x2c   : > { %830 = vmatprep.subr.mxu0 %v1069_v0  ;;  %vm460_vm4 = vcmp.lt.s32.totalorder %v1166_v8, %v459_v48  ;;  %vm464_vm7 = vcmp.eq.s32.totalorder %v454_v42, 0  ;;  %p985_p10 = scmp.ne.s32.totalorder %s1216_s13, %s984_s23  ;;  %s988_s25 = sshll.u32 %s1075_s24, 4  ;;  %s989_s25 = int_to_ptr.vmem [resolvable:$false] %s988_s25 }
  0x2d   : > { %vm457_vm3 = vcmp.ge.s32.totalorder %v452_v38, %v455_v46  ;;  %vm461_vm5 = vcmp.lt.s32.totalorder %v452_v38, %v459_v48  ;;  %vm462_vm6 = vmand %vm456_vm2, %vm460_vm4  ;;  %s990_s9 = scalar_lea.vmem %s989_s25, 256  ;;  %p991_p13 = scmp.lt.s32.totalorder %s1216_s13, %s989_s25 }
  0x2e   : > { %828 = vmatmul.mubr.msk.f32.vlgmr.msra.gmra.mxu0 %vm133_vm1, %v130_v3  ;;  %vm463_vm8 = vmand %vm457_vm3, %vm461_vm5  ;;  %p986_p11 = pnand %p985_p10, %p1126_p4  ;;  %p992_p0 = scmp.lt.s32.totalorder %s990_s9, %s984_s23 }
  0x2f   : > { %831 = vmatpush3.xpose.msk.msra.mxu0 %vm133_vm1, %v130_v3  ;;  %832 = vmatprep.mubr.msk.f32.mxu0 %vm1070_vm0, %v1069_v0  ;;  %vm466_vm9 = vmor %vm464_vm7, %vm463_vm8 }
  0x30   : > { %vm465_vm10 = vmor %vm464_vm7, %vm462_vm6  ;;  %835 = vmatprep.subr.msk.mxu1 %vm466_vm9, %v1072_v57  ;;  %p987_p12 = pneg %p986_p11  ;;  %p993_p1 = por %p992_p0, %p991_p13 }
  0x31   : > { %836 = vmatpush3.msk.msra.mxu1 %vm466_vm9, %v1072_v57 }
  0x32   : > { %833 = vmatmul.mubr.msk.f32.vlgmr.msra.gmra.mxu0 %vm133_vm1, %v130_v3  ;;  %837 = vmatprep.subr.msk.mxu1 %vm465_vm10, %v1072_v57  ;;  %p994_p2 = pnand %p993_p1, %p987_p12 }
  0x33   : > { %838 = vmatpush3.msk.msra.mxu1 %vm465_vm10, %v1072_v57 }
  0xee   : > { %v209_v10 = vpop.f32.mrf.mxu0 }
  0xef   : > { %v286_v11 = vmul.f32 50.0, %v209_v10 }
  0xf0   : > { %v829_v12 = vpop.f32.mrf.mxu0 }
  0xf1   : > { %v289_v13 = vcombine.high %v286_v11, %v286_v11  ;;  %v296_v14 = vrot.slane %v286_v11, %v295_v9 }
  0xf2   : > { %v282_v17 = vpop.f32.mrf.mxu0 }
  0xf3   : > { %v304_v19 = vcombine.high %v296_v14, %v296_v14  ;;  %v1174_v20 = vrot.slane %v296_v14, %v295_v9  ;;  %v287_v21 = vmul.f32 50.0, %v282_v17  ;;  %v303_v22 = vrot.slane %v289_v13, %v295_v9 }
  0xf4   : > { %v834_v23 = vpop.f32.mrf.mxu0 }
  0xf5   : > { %v355_v25 = vrot.slane %v287_v21, %v354_v15  ;;  %v341_v26 = vrot.slane %v287_v21, %v1171_v16  ;;  %v362_v27 = vrot.slane %v287_v21, %v361_v18  ;;  %v334_v32 = vcombine.high %v1174_v20, %v1174_v20 }
  0xf6   : > { %v397_v33 = vrot.slane %v1174_v20, %v1171_v16  ;;  %v326_v34 = vrot.slane %v304_v19, %v295_v9  ;;  %v348_v35 = vrot.slane %v287_v21, %v347_v24  ;;  %v305_v36 = vcombine.high %v303_v22, %v303_v22 }
  0xf7   : > { %357 = vbcast.lane.b32.xlu1 %v355_v25, 256  ;;  %343 = vbcast.lane.b32.xlu0 %v341_v26, 256  ;;  %v319_v37 = vrot.slane %v303_v22, %v295_v9  ;;  %v405_v39 = vrot.slane %v334_v32, %v1171_v16  ;;  %v376_v52 = vrot.slane %v287_v21, %v375_v28 }
  0xf8   : > { %v336_v40 = vcombine.high %v326_v34, %v326_v34  ;;  %v401_v41 = vrot.slane %v326_v34, %v1171_v16  ;;  %v333_v43 = vrot.slane %v305_v36, %v295_v9  ;;  %v369_v53 = vrot.slane %v287_v21, %v368_v29 }
  0xf9   : > { %v413_v44 = vrot.slane %v319_v37, %v1171_v16  ;;  %v335_v45 = vcombine.high %v319_v37, %v319_v37  ;;  %v390_v55 = vrot.slane %v287_v21, %v389_v30  ;;  %v383_v56 = vrot.slane %v287_v21, %v382_v31 }
  0xfa   : > { %v409_v47 = vrot.slane %v336_v40, %v1171_v16  ;;  %v417_v49 = vrot.slane %v333_v43, %v1171_v16  ;;  %v337_v50 = vcombine.high %v333_v43, %v333_v43  ;;  %v1074_v34 = vmov 1  }
  0xfb   : > { %364 = vbcast.lane.b32.xlu1 %v362_v27, 256  ;;  %350 = vbcast.lane.b32.xlu0 %v348_v35, 256  ;;  %v421_v51 = vrot.slane %v335_v45, %v1171_v16 }
  0xfc   : > { %v425_v54 = vrot.slane %v337_v50, %v1171_v16  ;;  %925 = vset.pattern.permute.xlu0 %v1074_v34 }
  0xff   : > { %378 = vbcast.lane.b32.xlu1 %v376_v52, 256  ;;  %371 = vbcast.lane.b32.xlu0 %v369_v53, 256 }
 0x103   : > { %392 = vbcast.lane.b32.xlu1 %v390_v55, 256  ;;  %385 = vbcast.lane.b32.xlu0 %v383_v56, 256 }
 0x169   : > { %v358_v58 = vpop.permute.xlu1 %357  ;;  %v344_v59 = vpop.permute.xlu0 %343 }
 0x16a   : > { %v434_v60 = vsub.f32 %v397_v33, %v344_v59  ;;  %v436_v63 = vsub.f32 %v405_v39, %v358_v58 }
 0x16c   : > { %926 = vtanh.f32 %v434_v60 }
 0x16d   : > { %v365_v61 = vpop.permute.xlu1 %364  ;;  %v351_v62 = vpop.permute.xlu0 %350 }
 0x16e   : > { %v435_v0 = vsub.f32 %v401_v41, %v351_v62  ;;  %v437_v1 = vsub.f32 %v409_v47, %v365_v61 }
 0x170   : > { %928 = vtanh.f32 %v435_v0 }
 0x171   : > { %v379_v2 = vpop.permute.xlu1 %378  ;;  %v372_v3 = vpop.permute.xlu0 %371  ;;  %930 = vtanh.f32 %v436_v63 }
 0x172   : > { %v438_v4 = vsub.f32 %v413_v44, %v372_v3  ;;  %932 = vtanh.f32 %v437_v1  ;;  %v439_v5 = vsub.f32 %v417_v49, %v379_v2 }
 0x174   : > { %934 = vtanh.f32 %v438_v4 }
 0x175   : > { %v386_v6 = vpop.permute.xlu0 %385  ;;  %v393_v7 = vpop.permute.xlu1 %392  ;;  %936 = vtanh.f32 %v439_v5 }
 0x176   : > { %v440_v8 = vsub.f32 %v421_v51, %v386_v6  ;;  %v441_v9 = vsub.f32 %v425_v54, %v393_v7 }
 0x178   : > { %938 = vtanh.f32 %v440_v8 }
 0x179   : > { %v927_v10 = vpop.eup %926  ;;  %940 = vtanh.f32 %v441_v9 }
 0x17a   : > { %839 = vmatprep.mubr.msk.f32.mxu1 %vm469_vm11, %v927_v10 }
 0x17d   : > { %v929_v11 = vpop.eup %928 }
 0x17e   : > { %v931_v12 = vpop.eup %930  ;;  %840 = vmatmul.mubr.msk.f32.vlgmr.msra.gmra.mxu1 %vm469_vm11, %v929_v11 }
 0x17f   : > { %842 = vmatprep.mubr.msk.f32.mxu1 %vm469_vm11, %v931_v12  ;;  %v933_v13 = vpop.eup %932 }
 0x181   : > { %v935_v14 = vpop.eup %934 }
 0x182   : > { %843 = vmatmul.mubr.msk.f32.gmra.mxu1 %vm469_vm11, %v933_v13  ;;  %v937_v15 = vpop.eup %936 }
 0x183   : > { %845 = vmatprep.mubr.msk.f32.mxu1 %vm469_vm11, %v935_v14 }
 0x185   : > { %v939_v16 = vpop.eup %938 }
 0x186   : > { %846 = vmatmul.mubr.msk.f32.gmra.mxu1 %vm469_vm11, %v937_v15  ;;  %v941_v17 = vpop.eup %940 }
 0x187   : > { %848 = vmatprep.mubr.msk.f32.mxu1 %vm469_vm11, %v939_v16 }
 0x18a   : > { %849 = vmatmul.mubr.msk.f32.gmra.mxu1 %vm469_vm11, %v941_v17 }
 0x23e   : > { %v841_v18 = vpop.f32.mrf.mxu1 }
 0x23f   : > { %v608_v19 = vadd.f32 17.0, %v841_v18  ;;  %v600_v42 = vadd.f32 9.0, %v841_v18 }
 0x240   : > { %v560_v20 = vpop.f32.mrf.mxu1 }
 0x241   : > { %v607_v21 = vadd.f32 17.0, %v560_v20  ;;  %625 = vrot.lane.b32.xlu1 %v608_v19, %s1073_s3  ;;  %v599_v45 = vadd.f32 9.0, %v560_v20 }
 0x242   : > { %v844_v22 = vpop.f32.mrf.mxu1 }
 0x243   : > { %v610_v23 = vadd.f32 17.0, %v844_v22  ;;  %623 = vrot.lane.b32.xlu0 %v607_v21, %s1073_s3  ;;  %v602_v50 = vadd.f32 9.0, %v844_v22 }
 0x244   : > { %v570_v24 = vpop.f32.mrf.mxu1 }
 0x245   : > { %v609_v25 = vadd.f32 17.0, %v570_v24  ;;  %629 = vrot.lane.b32.xlu1 %v610_v23, %s1073_s3  ;;  %v601_v51 = vadd.f32 9.0, %v570_v24 }
 0x246   : > { %v847_v26 = vpop.f32.mrf.mxu1 }
 0x247   : > { %v612_v27 = vadd.f32 17.0, %v847_v26  ;;  %627 = vrot.lane.b32.xlu0 %v609_v25, %s1073_s3  ;;  %v604_v59 = vadd.f32 9.0, %v847_v26 }
 0x248   : > { %v580_v28 = vpop.f32.mrf.mxu1 }
 0x249   : > { %v611_v29 = vadd.f32 17.0, %v580_v28  ;;  %633 = vrot.lane.b32.xlu1 %v612_v27, %s1073_s3  ;;  %v603_v60 = vadd.f32 9.0, %v580_v28 }
 0x24a   : > { %v850_v30 = vpop.f32.mrf.mxu1 }
 0x24b   : > { %v614_v31 = vadd.f32 17.0, %v850_v30  ;;  %631 = vrot.lane.b32.xlu0 %v611_v29, %s1073_s3  ;;  %v606_v5 = vadd.f32 9.0, %v850_v30 }
 0x24c   : > { %v590_v32 = vpop.f32.mrf.mxu1 }
 0x24d   : > { %v613_v33 = vadd.f32 17.0, %v590_v32  ;;  %637 = vrot.lane.b32.xlu1 %v614_v31, %s1073_s3  ;;  %v605_v6 = vadd.f32 9.0, %v590_v32 }
 0x24f   : > { %635 = vrot.lane.b32.xlu0 %v613_v33, %s1073_s3 }
 0x2b3   : > { %v626_v35 = vpop.permute.xlu1 %625 }
 0x2b4   : > { %942 = vrcp.f32 %v626_v35 }
 0x2b5   : > { %v624_v36 = vpop.permute.xlu0 %623 }
 0x2b6   : > { %944 = vrcp.f32 %v624_v36 }
 0x2b7   : > { %v630_v37 = vpop.permute.xlu1 %629 }
 0x2b8   : > { %946 = vrcp.f32 %v630_v37 }
 0x2b9   : > { %v628_v38 = vpop.permute.xlu0 %627 }
 0x2ba   : > { %948 = vrcp.f32 %v628_v38 }
 0x2bb   : > { %v634_v39 = vpop.permute.xlu1 %633 }
 0x2bc   : > { %950 = vrcp.f32 %v634_v39 }
 0x2bd   : > { %v632_v40 = vpop.permute.xlu0 %631 }
 0x2be   : > { %952 = vrcp.f32 %v632_v40 }
 0x2bf   : > { %v638_v41 = vpop.permute.xlu1 %637 }
 0x2c0   : > { %954 = vrcp.f32 %v638_v41 }
 0x2c1   : > { %v943_v43 = vpop.eup %942  ;;  %v636_v44 = vpop.permute.xlu0 %635 }
 0x2c2   : > { %v650_v46 = vmul.f32 %v943_v43, %v600_v42  ;;  %956 = vrcp.f32 %v636_v44 }
 0x2c3   : > { %v945_v47 = vpop.eup %944 }
 0x2c4   : > { %v648_v48 = vmul.f32 %v945_v47, %v599_v45  ;;  %v665_v52 = vsel %vm663_vm12, %v650_v46, 0.0 }
 0x2c5   : > { %v947_v49 = vpop.eup %946 }
 0x2c6   : > { %v664_v53 = vsel %vm663_vm12, %v648_v48, 0.0  ;;  %v654_v56 = vmul.f32 %v947_v49, %v602_v50 }
 0x2c7   : > { %v949_v54 = vpop.eup %948  ;;  %v666_v55 = vadd.f32 %v665_v52, %v664_v53 }
 0x2c8   : > { %v652_v57 = vmul.f32 %v949_v54, %v601_v51  ;;  %v669_v0 = vsel %vm663_vm12, %v654_v56, 0.0 }
 0x2c9   : > { %v951_v58 = vpop.eup %950 }
 0x2ca   : > { %v667_v61 = vsel %vm663_vm12, %v652_v57, 0.0  ;;  %v658_v1 = vmul.f32 %v951_v58, %v604_v59 }
 0x2cb   : > { %v953_v62 = vpop.eup %952  ;;  %v668_v63 = vadd.f32 %v667_v61, %v666_v55 }
 0x2cc   : > { %v656_v2 = vmul.f32 %v953_v62, %v603_v60  ;;  %v673_v12 = vsel %vm663_vm12, %v658_v1, 0.0 }
 0x2cd   : > { %v955_v3 = vpop.eup %954  ;;  %v670_v4 = vadd.f32 %v669_v0, %v668_v63 }
 0x2ce   : > { %v671_v7 = vsel %vm663_vm12, %v656_v2, 0.0  ;;  %v662_v11 = vmul.f32 %v955_v3, %v606_v5 }
 0x2cf   : > { %v957_v8 = vpop.eup %956  ;;  %v672_v9 = vadd.f32 %v671_v7, %v670_v4 }
 0x2d0   : > { %v660_v10 = vmul.f32 %v957_v8, %v605_v6  ;;  %v677_v16 = vsel %vm663_vm12, %v662_v11, 0.0 }
 0x2d1   : > { %v674_v13 = vadd.f32 %v673_v12, %v672_v9 }
 0x2d2   : > { %v675_v14 = vsel %vm663_vm12, %v660_v10, 0.0 }
 0x2d3   : > { %v676_v15 = vadd.f32 %v675_v14, %v674_v13 }
 0x2d5   : > { %v678_v17 = vadd.f32 %v677_v16, %v676_v15 }
 0x2d7   : > { %v679_v18 = vrot.slane %v678_v17, 4 }
 0x2d9   : > { %v680_v19 = vadd.f32 %v679_v18, %v678_v17 }
 0x2db   : > { %v681_v20 = vrot.slane %v680_v19, 2 }
 0x2dd   : > { %v682_v21 = vadd.f32 %v681_v20, %v680_v19 }
 0x2df   : > { %v683_v22 = vrot.slane %v682_v21, 1 }
 0x2e1   : > { %v684_v23 = vadd.f32 %v683_v22, %v682_v21 }
 0x2e3   : > { %v685_v24 = vmul.f32 0.0078125, %v684_v23 }
 0x2e5   : > { %688 = vperm.xlu0 %925, %v685_v24  }
 0x360   : > { %v689_v25 = vpop.permute.xlu0 %688 }
 0x361   : > { %691 = vst [vmem:[%s123_s12] sm:$0xff] %v689_v25 }
 0x362   : > { %997 = shalt.err (!%p994_p2)
}
 0x363   : > { %s998_s26 = scalar_lea.hbm %s705_s21, 128  ;;  %s1002_s29 = scalar_lea.hbm %s1260_s1, 256 }
 0x364   : > { %p999_p3 = scmp.ne.s32.totalorder %s705_s21, %s998_s26  ;;  %p1003_p7 = scmp.lt.s32.totalorder %s705_s21, %s1260_s1 }
 0x365   : > { %p1004_p9 = scmp.lt.s32.totalorder %s1002_s29, %s998_s26 }
 0x366   : > { %p1000_p5 = pnand %p999_p3, %p1126_p4 }
 0x367   : > { %p1005_p10 = por %p1004_p9, %p1003_p7 }
 0x368   : > { %p1001_p6 = pneg %p1000_p5 }
 0x36a   : > { %p1006_p11 = pnand %p1005_p10, %p1001_p6 }
 0x36c   : > { %1009 = shalt.err (!%p1006_p11)
}
 0x36d   : > { %855 = dma.vmem_to_hbm [thread:$0]  (%p1126_p4), %s1216_s13, 128, %s705_s21, %s693_s22  }
 0x36e PF: > { %p867_p12 = scmp.ge.s32.totalorder %s1064_s11, 2  ;;  %s719_s3 = sand.u32 1, %s1044_s6  }
 0x36f   : > { %s720_s4 = scalar_lea.sflag [#allocation4], %s719_s3 }
 0x370   : > { %p862_p13 = pnand %p867_p12, %p1133_p8 }
 0x372   : > { %p863_p0 = pneg %p862_p13 }
 0x374   : > { %1039 = dma.done.wait (%p863_p0), %s720_s4, 128  }
 0x375   : > { %1041 = vsyncadd (%p863_p0), %s720_s4, 4294967168  ;;  %s15_s11 = sadd.s32 1, %s1064_s11   ;;  %s1265_s6 = smov %s1048_s7 }
 0x376   : > { %p12_p1 = scmp.ge.s32.totalorder %s15_s11, 4   ;;  %s1266_s7 = smov %s1052_s8 }
 0x377   : > { %s1267_s8 = smov %s1139_s19  ;;  %s1268_s9 = smov %s1060_s10 }
 0x378   : > { %s1269_s10 = smov %s1271_s14  ;;  %14 = sbr.rel (!%p12_p1) target bundleno = 5 (0x5), region = 63 }
 0x37d   :  { %725 = vsyncpa [#allocation3], 1 }
 0x37e   :  { %727 = vsyncpa [#allocation3 + $0x1], 1 }
 0x37f   :  { %728 = vsyncpa [#allocation4], 1 }
 0x380   :  { %730 = vsyncpa [#allocation4 + $0x1], 1 }

</bundles_post_ra>
